<compile_context>
chip_gen: v5e
topology: v5e:2x2
jax: 0.10.0
libtpu: 0.0.40
codegen_flags: <defaults>
</compile_context>

<pallas_src>
import functools

import jax
import jax.numpy as jnp
from jax import lax
from jax.experimental import pallas as pl
from jax.experimental.pallas import tpu as pltpu


def _gelu_exact(x):
    # PyTorch nn.GELU() default = exact erf formulation (computed in f32).
    return 0.5 * x * (1.0 + lax.erf(x * 0.7071067811865476))


def ffn_kernel(x_ref, w1_ref, b1_ref, w2_ref, b2_ref, o_ref, acc_ref):
    # x_ref:  (tm, dim_p)          -- resident across the kh axis (index map ignores kh)
    # w1_ref: (dim_p, th)  b1_ref: (1, th)      -- hidden slice kh
    # w2_ref: (th, dim_p)  b2_ref: (1, dim_p)
    # o_ref:  (tm, dim_p)  acc_ref: (tm, dim_p) f32 VMEM scratch
    kh = pl.program_id(1)

    @pl.when(kh == 0)
    def _():
        # Fold b2 into the accumulator init (bias added exactly once per row tile).
        acc_ref[...] = jnp.broadcast_to(
            b2_ref[...].astype(jnp.float32), acc_ref.shape
        )

    h = jnp.dot(x_ref[...], w1_ref[...], preferred_element_type=jnp.float32)
    h = h + b1_ref[...].astype(jnp.float32)
    h = _gelu_exact(h)
    # Dropout (p=0.0 / eval mode) is identity here.
    acc_ref[...] += jnp.dot(
        h.astype(w2_ref.dtype), w2_ref[...], preferred_element_type=jnp.float32
    )

    @pl.when(kh == pl.num_programs(1) - 1)
    def _():
        o_ref[...] = acc_ref[...].astype(o_ref.dtype)


def _round_up(x, m):
    return ((x + m - 1) // m) * m


def _pad2d(a, rows, cols, dtype):
    a = a.astype(dtype)
    pr, pc = rows - a.shape[0], cols - a.shape[1]
    if pr or pc:
        a = jnp.pad(a, ((0, pr), (0, pc)))
    return a


@functools.lru_cache(maxsize=1)
def _vmem_budget_bytes():
    """Usable VMEM budget per TensorCore (generation-aware, conservative fallback)."""
    try:
        info = pltpu.get_tpu_info()
        cap = getattr(info, "vmem_capacity_bytes", None)
        if cap:
            # ~102 MiB on v5e/v6e (128 MiB physical), ~51 MiB on v7x (64 MiB physical).
            return int(cap * 0.8)
    except Exception:
        pass
    return 48 * 1024 * 1024  # safe everywhere (below v7x's 64 MiB physical VMEM)


def _working_set_bytes(tm, th, dim_p, bc, bo):
    return (2 * tm * dim_p * bc        # x tile (double-buffered)
            + 4 * dim_p * th * bc      # W1 + W2 tiles (double-buffered)
            + 2 * (th + dim_p) * 4     # biases (double-buffered, f32)
            + 2 * tm * dim_p * bo      # out tile (double-buffered)
            + tm * dim_p * 4           # f32 accumulator scratch
            + tm * th * (4 + bc))      # f32 hidden intermediate + its cast


def _choose_tiles(n_tokens, dim_p, hid_p, bc, bo, budget):
    # Generation-aware targets: big rows on big-VMEM chips (v5e/v6e), moderate on v7x.
    if budget >= 80 * 1024 * 1024:
        tm_target, th_target = 1024, 1024
    else:
        tm_target, th_target = 512, 768

    tm_cap = max(16, min(tm_target, _round_up(n_tokens, 16)))

    def max_tm(th):
        fixed = 4 * dim_p * th * bc + 2 * (th + dim_p) * 4
        per_row = dim_p * (2 * bc + 2 * bo + 4) + th * (4 + bc)
        avail = budget - fixed
        if avail <= 0:
            return 0
        return int(min(tm_cap, (avail // per_row) // 16 * 16))

    divs = [d for d in range(128, hid_p + 1, 128) if hid_p % d == 0]

    # 1) Prefer weights fully resident (single hidden step): W1/W2 then get DMA'd
    #    exactly once instead of once per row tile -- the biggest win for small/medium
    #    FFNs -- as long as a decent row tile still fits.
    tm_full = max_tm(hid_p)
    if tm_full >= min(tm_cap, 256):
        return tm_full, hid_p

    # 2) Otherwise the largest divisor of hid_p that is a multiple of 256 (full-width
    #    MXU on v6e/v7x) and <= th_target; fall back to 128-multiples.
    for align in (256, 128):
        for th in sorted((d for d in divs if d % align == 0 and d <= th_target),
                         reverse=True):
            tm = max_tm(th)
            if tm >= min(tm_cap, 128):
                return tm, th

    # 3) Last resort: smallest tiles.
    th = divs[0]
    return max(16, max_tm(th)), th


@functools.partial(jax.jit, static_argnames=("tile_m", "tile_h", "compute_dtype"))
def feedforward(x, w1, b1, w2, b2, *, tile_m=None, tile_h=None,
                compute_dtype=jnp.bfloat16):
    """x: (..., dim) -> (..., dim). Dropout is identity (p=0 / eval).

    Matmul inputs default to bf16 (MXU peak on all TPU generations); accumulation is
    always f32 and the output keeps x.dtype. Pass compute_dtype=jnp.float32 for
    tight f32 parity with the PyTorch module.
    """
    orig_shape = x.shape
    out_dtype = x.dtype
    dim = orig_shape[-1]
    hidden = w1.shape[1]

    x2d = x.reshape(-1, dim)
    n_tokens = x2d.shape[0]

    cdt = jnp.dtype(compute_dtype)
    bc = cdt.itemsize
    bo = jnp.dtype(out_dtype).itemsize

    # --- Lane-dense feature padding (multiples of 128) ---------------------------
    dim_p = _round_up(dim, 128)
    hid_p = _round_up(hidden, 128)

    # --- Tile selection (auto, VMEM-budgeted; manual overrides respected) ----------
    budget = _vmem_budget_bytes()
    tm_auto, th_auto = _choose_tiles(n_tokens, dim_p, hid_p, bc, bo, budget)

    if tile_m is None:
        tm = tm_auto
    else:
        tm = _round_up(max(16, min(int(tile_m), _round_up(n_tokens, 16))), 16)
    if tile_h is None:
        th = th_auto
    else:
        th = min(_round_up(int(tile_h), 128), hid_p)
        while hid_p % th != 0:
            th -= 128

    n_p = _round_up(n_tokens, tm)
    n_m = n_p // tm
    n_kh = hid_p // th

    # --- Pad / cast operands once at the wrapper -----------------------------------
    xp = _pad2d(x2d, n_p, dim_p, cdt)
    w1p = _pad2d(w1, dim_p, hid_p, cdt)
    w2p = _pad2d(w2, hid_p, dim_p, cdt)
    b1p = _pad2d(b1.reshape(1, -1), 1, hid_p, jnp.float32)
    b2p = _pad2d(b2.reshape(1, -1), 1, dim_p, jnp.float32)

    # --- VMEM limit from the real working set (tiles were clamped to fit budget) ---
    ws = _working_set_bytes(tm, th, dim_p, bc, bo)
    needed = int(ws * 1.2) + (2 << 20)          # headroom for Mosaic internal scratch
    vmem_limit = min(max(needed, 32 * 1024 * 1024), max(budget, needed))

    # --- Cost estimate (includes repeated weight reads when hidden axis is tiled) --
    w_bytes = (w1p.size + w2p.size) * bc
    w_reads = n_m if n_kh > 1 else 1
    cost = pl.CostEstimate(
        flops=int(4 * n_p * dim_p * hid_p),                   # two matmuls
        transcendentals=int(n_p * hid_p),                     # erf per hidden element
        bytes_accessed=int(xp.size * bc + w_reads * w_bytes
                           + (b1p.size + b2p.size) * 4 + n_p * dim_p * bo),
    )

    grid = (n_m, n_kh)

    out = pl.pallas_call(
        ffn_kernel,
        out_shape=jax.ShapeDtypeStruct((n_p, dim_p), out_dtype),
        grid_spec=pltpu.PrefetchScalarGridSpec(
            num_scalar_prefetch=0,
            grid=grid,
            in_specs=[
                pl.BlockSpec((tm, dim_p), lambda i, kh: (i, 0)),   # x tile (resident over kh)
                pl.BlockSpec((dim_p, th), lambda i, kh: (0, kh)),  # W1 hidden-slice
                pl.BlockSpec((1, th), lambda i, kh: (0, kh)),      # b1 hidden-slice
                pl.BlockSpec((th, dim_p), lambda i, kh: (kh, 0)),  # W2 hidden-slice
                pl.BlockSpec((1, dim_p), lambda i, kh: (0, 0)),    # b2
            ],
            out_specs=pl.BlockSpec((tm, dim_p), lambda i, kh: (i, 0)),
            scratch_shapes=[pltpu.VMEM((tm, dim_p), jnp.float32)],
        ),
        compiler_params=pltpu.CompilerParams(
            dimension_semantics=("parallel", "arbitrary"),
            vmem_limit_bytes=int(vmem_limit),
        ),
        cost_estimate=cost,
    )(xp, w1p, b1p, w2p, b2p)

    out = out[:n_tokens, :dim]
    return out.reshape(orig_shape)


def init_params(key, dim, hidden_dim, dtype=jnp.float32):
    # Deterministic init mimicking nn.Linear's U(-1/sqrt(fan_in), 1/sqrt(fan_in)).
    k1, k2, k3, k4 = jax.random.split(key, 4)
    lim1 = 1.0 / jnp.sqrt(dim)
    lim2 = 1.0 / jnp.sqrt(hidden_dim)
    # Weights stored as (in_features, out_features) == transposed PyTorch layout.
    w1 = jax.random.uniform(k1, (dim, hidden_dim), dtype, -lim1, lim1)
    b1 = jax.random.uniform(k2, (1, hidden_dim), dtype, -lim1, lim1)
    w2 = jax.random.uniform(k3, (hidden_dim, dim), dtype, -lim2, lim2)
    b2 = jax.random.uniform(k4, (1, dim), dtype, -lim2, lim2)
    return w1, b1, w2, b2


def _reference(x, w1, b1, w2, b2):
    h = jax.nn.gelu(x @ w1 + b1.reshape(-1), approximate=False)
    return h @ w2 + b2.reshape(-1)


if __name__ == "__main__":
    key = jax.random.PRNGKey(0)
    batch, seq, dim, hidden_dim = 2, 8, 32, 64

    kx, kp = jax.random.split(key)
    x = jax.random.normal(kx, (batch, seq, dim), jnp.float32)
    w1, b1, w2, b2 = init_params(kp, dim, hidden_dim)
    ref = _reference(x, w1, b1, w2, b2)

    # f32 compute path: matches PyTorch eval-mode FeedForward (exact erf GELU, p=0 dropout).
    out_f32 = jax.block_until_ready(
        feedforward(x, w1, b1, w2, b2, compute_dtype=jnp.float32))
    assert out_f32.shape == x.shape
    assert jnp.allclose(out_f32, ref, atol=1e-5, rtol=1e-5), "f32 mismatch vs reference"

    # Default path: bf16 matmul inputs (MXU peak), f32 accumulation, loose tolerance.
    out_bf16 = jax.block_until_ready(feedforward(x, w1, b1, w2, b2))
    assert out_bf16.shape == x.shape
    assert jnp.allclose(out_bf16, ref, atol=1e-1, rtol=1e-1), "bf16 mismatch vs reference"

    # Non-aligned shapes with forced small tiles: exercises feature padding, multiple
    # M tiles (parallel axis) and the hidden-reduction (accumulator) axis.
    x2 = jax.random.normal(jax.random.PRNGKey(1), (3, 70, 160), jnp.float32)
    w1b, b1b, w2b, b2b = init_params(jax.random.PRNGKey(2), 160, 384)
    out2 = jax.block_until_ready(
        feedforward(x2, w1b, b1b, w2b, b2b, tile_m=128, tile_h=128,
                    compute_dtype=jnp.float32))
    ref2 = _reference(x2, w1b, b1b, w2b, b2b)
    assert out2.shape == x2.shape
    assert jnp.allclose(out2, ref2, atol=2e-4, rtol=2e-4), "multi-tile mismatch vs reference"

    # TODO(synk): training-mode dropout (p > 0) would need pltpu.prng_seed /
    # prng_random_bits; module default p=0.0 / eval makes it an identity here.
    print("KERNEL_OK")
</pallas_src>

<mosaic_0001>
module attributes {stable_mosaic.version = 11 : i64} {
  func.func @ffn_kernel(%arg0: i32, %arg1: i32, %arg2: memref<16x128xf32, #tpu.memory_space<vmem>>, %arg3: memref<128x128xf32, #tpu.memory_space<vmem>>, %arg4: memref<1x128xf32, #tpu.memory_space<vmem>>, %arg5: memref<128x128xf32, #tpu.memory_space<vmem>>, %arg6: memref<1x128xf32, #tpu.memory_space<vmem>>, %arg7: memref<16x128xf32, #tpu.memory_space<vmem>>, %arg8: memref<16x128xf32, #tpu.memory_space<vmem>>) attributes {dimension_semantics = [#tpu.dimension_semantics<parallel>, #tpu.dimension_semantics<arbitrary>], iteration_bounds = array<i64: 1, 1>, scalar_prefetch = 0 : i64, scratch_operands = 1 : i64, tpu.core_type = #tpu.core_type<tc>, window_params = [{transform_indices = @transform_0, window_bounds = array<i64: 16, 128>}, {transform_indices = @transform_1, window_bounds = array<i64: 128, 128>}, {transform_indices = @transform_2, window_bounds = array<i64: 1, 128>}, {transform_indices = @transform_3, window_bounds = array<i64: 128, 128>}, {pipeline_mode = #tpu.pipeline_mode<synchronous>, transform_indices = @transform_4, window_bounds = array<i64: 1, 128>}, {transform_indices = @transform_5, window_bounds = array<i64: 16, 128>}]} {
    %c0_i32 = arith.constant 0 : i32
    %0 = arith.cmpi eq, %arg1, %c0_i32 : i32
    %1 = arith.extui %0 : i1 to i32
    %c0_i32_0 = arith.constant 0 : i32
    %2 = arith.cmpi ne, %1, %c0_i32_0 : i32
    scf.if %2 {
      %c0_18 = arith.constant 0 : index
      %c0_19 = arith.constant 0 : index
      %25 = vector.load %arg6[%c0_18, %c0_19] : memref<1x128xf32, #tpu.memory_space<vmem>>, vector<1x128xf32>
      %26 = vector.shape_cast %25 : vector<1x128xf32> to vector<1x128xf32>
      %27 = vector.broadcast %26 : vector<1x128xf32> to vector<16x128xf32>
      %c0_20 = arith.constant 0 : index
      %c0_21 = arith.constant 0 : index
      %28 = vector.load %arg8[%c0_20, %c0_21] : memref<16x128xf32, #tpu.memory_space<vmem>>, vector<16x128xf32>
      tpu.vector_store %arg8[%c0_20, %c0_21], %27 {strides = array<i32>} : memref<16x128xf32, #tpu.memory_space<vmem>>, vector<16x128xf32>,
    } else {
    }
    %c0 = arith.constant 0 : index
    %c0_1 = arith.constant 0 : index
    %3 = vector.load %arg2[%c0, %c0_1] : memref<16x128xf32, #tpu.memory_space<vmem>>, vector<16x128xf32>
    %c0_2 = arith.constant 0 : index
    %c0_3 = arith.constant 0 : index
    %4 = vector.load %arg3[%c0_2, %c0_3] : memref<128x128xf32, #tpu.memory_space<vmem>>, vector<128x128xf32>
    %cst = arith.constant dense<0.000000e+00> : vector<16x128xf32>
    %5 = tpu.matmul %3, %4, %cst {dimension_numbers = #tpu.dot_dimension_numbers<[1], [0], [0], [1], [0, 0, 1, 1], [], []>} : vector<16x128xf32>, vector<128x128xf32>, vector<16x128xf32> -> vector<16x128xf32>
    %c0_4 = arith.constant 0 : index
    %c0_5 = arith.constant 0 : index
    %6 = vector.load %arg4[%c0_4, %c0_5] : memref<1x128xf32, #tpu.memory_space<vmem>>, vector<1x128xf32>
    %7 = vector.broadcast %6 : vector<1x128xf32> to vector<16x128xf32>
    %8 = arith.addf %5, %7 : vector<16x128xf32>
    %cst_6 = arith.constant 5.000000e-01 : f32
    %9 = vector.broadcast %cst_6 : f32 to vector<16x128xf32>
    %10 = arith.mulf %9, %8 : vector<16x128xf32>
    %cst_7 = arith.constant 0.707106769 : f32
    %11 = vector.broadcast %cst_7 : f32 to vector<16x128xf32>
    %12 = arith.mulf %8, %11 : vector<16x128xf32>
    %13 = math.erf %12 : vector<16x128xf32>
    %cst_8 = arith.constant 1.000000e+00 : f32
    %14 = vector.broadcast %cst_8 : f32 to vector<16x128xf32>
    %15 = arith.addf %14, %13 : vector<16x128xf32>
    %16 = arith.mulf %10, %15 : vector<16x128xf32>
    %c0_9 = arith.constant 0 : index
    %c0_10 = arith.constant 0 : index
    %17 = vector.load %arg8[%c0_9, %c0_10] : memref<16x128xf32, #tpu.memory_space<vmem>>, vector<16x128xf32>
    %c0_11 = arith.constant 0 : index
    %c0_12 = arith.constant 0 : index
    %18 = vector.load %arg5[%c0_11, %c0_12] : memref<128x128xf32, #tpu.memory_space<vmem>>, vector<128x128xf32>
    %cst_13 = arith.constant dense<0.000000e+00> : vector<16x128xf32>
    %19 = tpu.matmul %16, %18, %cst_13 {dimension_numbers = #tpu.dot_dimension_numbers<[1], [0], [0], [1], [0, 0, 1, 1], [], []>} : vector<16x128xf32>, vector<128x128xf32>, vector<16x128xf32> -> vector<16x128xf32>
    %20 = arith.addf %17, %19 : vector<16x128xf32>
    %c0_14 = arith.constant 0 : index
    %c0_15 = arith.constant 0 : index
    %21 = vector.load %arg8[%c0_14, %c0_15] : memref<16x128xf32, #tpu.memory_space<vmem>>, vector<16x128xf32>
    tpu.vector_store %arg8[%c0_14, %c0_15], %20 {strides = array<i32>} : memref<16x128xf32, #tpu.memory_space<vmem>>, vector<16x128xf32>,
    %c0_i32_16 = arith.constant 0 : i32
    %22 = arith.cmpi eq, %arg1, %c0_i32_16 : i32
    %23 = arith.extui %22 : i1 to i32
    %c0_i32_17 = arith.constant 0 : i32
    %24 = arith.cmpi ne, %23, %c0_i32_17 : i32
    scf.if %24 {
      %c0_18 = arith.constant 0 : index
      %c0_19 = arith.constant 0 : index
      %25 = vector.load %arg8[%c0_18, %c0_19] : memref<16x128xf32, #tpu.memory_space<vmem>>, vector<16x128xf32>
      %c0_20 = arith.constant 0 : index
      %c0_21 = arith.constant 0 : index
      %26 = vector.load %arg7[%c0_20, %c0_21] : memref<16x128xf32, #tpu.memory_space<vmem>>, vector<16x128xf32>
      tpu.vector_store %arg7[%c0_20, %c0_21], %25 {strides = array<i32>} : memref<16x128xf32, #tpu.memory_space<vmem>>, vector<16x128xf32>,
    } else {
    }
    return
  }
  func.func @transform_0(%arg0: i32, %arg1: i32) -> (i32, i32) {
    %c0_i32 = arith.constant 0 : i32
    %c0_i32_0 = arith.constant 0 : i32
    return %arg0, %c0_i32 : i32, i32
  }
  func.func @transform_1(%arg0: i32, %arg1: i32) -> (i32, i32) {
    %c0_i32 = arith.constant 0 : i32
    %c0_i32_0 = arith.constant 0 : i32
    return %c0_i32, %arg1 : i32, i32
  }
  func.func @transform_2(%arg0: i32, %arg1: i32) -> (i32, i32) {
    %c0_i32 = arith.constant 0 : i32
    %c0_i32_0 = arith.constant 0 : i32
    return %c0_i32, %arg1 : i32, i32
  }
  func.func @transform_3(%arg0: i32, %arg1: i32) -> (i32, i32) {
    %c0_i32 = arith.constant 0 : i32
    %c0_i32_0 = arith.constant 0 : i32
    return %arg1, %c0_i32 : i32, i32
  }
  func.func @transform_4(%arg0: i32, %arg1: i32) -> (i32, i32) {
    %c0_i32 = arith.constant 0 : i32
    %c0_i32_0 = arith.constant 0 : i32
    %c0_i32_1 = arith.constant 0 : i32
    return %c0_i32, %c0_i32_0 : i32, i32
  }
  func.func @transform_5(%arg0: i32, %arg1: i32) -> (i32, i32) {
    %c0_i32 = arith.constant 0 : i32
    %c0_i32_0 = arith.constant 0 : i32
    return %arg0, %c0_i32 : i32, i32
  }
}

</mosaic_0001>

<bundles_post_ra>
// kernel: feedforward.1
= control target key start
LH: loop header
LB: loop body
LE: loop exit
PB: predicated region body
PF: predicated region fallthrough
CT: control target
= control target key end

     0   :  { %s433_s1 = inlined_call_operand.vmem [shape: f32[128,128], index: 1, kind: input, shape index: {}]   ;;  %s434_s2 = inlined_call_operand.vmem [shape: f32[1,128], index: 2, kind: input, shape index: {}]   ;;  %s435_s0 = inlined_call_operand.vmem [shape: f32[16,128], index: 0, kind: input, shape index: {}]   ;;  %s436_s4 = inlined_call_operand.vmem [shape: f32[1,128], index: 4, kind: input, shape index: {}]   ;;  %s437_s3 = inlined_call_operand.vmem [shape: f32[128,128], index: 3, kind: input, shape index: {}]   ;;  %s438_s5 = inlined_call_operand.vmem [shape: f32[16,128], index: 5, kind: output, shape index: {}]  }
   0x1   :  { %v47_v0 = vld [vmem:[%s433_s1 + $0x78] sm:$0xff]  ;;  %v46_v1 = vld [vmem:[%s433_s1 + $0x70] sm:$0xff]  ;;  %v45_v2 = vld [vmem:[%s433_s1 + $0x68] sm:$0xff] }
   0x2   :  { %52 = vmatpush.msra.mxu0 %v47_v0  ;;  %221 = vmatpush.msra.mxu2 %v47_v0  ;;  %v44_v3 = vld [vmem:[%s433_s1 + $0x60] sm:$0xff]  ;;  %v43_v4 = vld [vmem:[%s433_s1 + $0x58] sm:$0xff]  ;;  %v42_v5 = vld [vmem:[%s433_s1 + $0x50] sm:$0xff] }
   0x3   :  { %v41_v6 = vld [vmem:[%s433_s1 + $0x48] sm:$0xff]  ;;  %v40_v7 = vld [vmem:[%s433_s1 + $0x40] sm:$0xff]  ;;  %v39_v8 = vld [vmem:[%s433_s1 + $0x38] sm:$0xff] }
   0x4   :  { %53 = vmatpush.msra.mxu0 %v46_v1  ;;  %222 = vmatpush.msra.mxu2 %v46_v1  ;;  %v38_v9 = vld [vmem:[%s433_s1 + $0x30] sm:$0xff]  ;;  %v37_v10 = vld [vmem:[%s433_s1 + $0x28] sm:$0xff]  ;;  %v36_v11 = vld [vmem:[%s433_s1 + $0x20] sm:$0xff] }
   0x5   :  { %v35_v12 = vld [vmem:[%s433_s1 + $0x18] sm:$0xff]  ;;  %v34_v13 = vld [vmem:[%s433_s1 + $0x10] sm:$0xff]  ;;  %v33_v14 = vld [vmem:[%s433_s1 + $0x8] sm:$0xff] }
   0x6   :  { %54 = vmatpush.msra.mxu0 %v45_v2  ;;  %223 = vmatpush.msra.mxu2 %v45_v2  ;;  %v32_v15 = vld [vmem:[%s433_s1] sm:$0xff]  ;;  %v31_v17 = vld [vmem:[%s435_s0 + $0x8] sm:$0xff]  ;;  %v180_v18 = vld [vmem:[%s437_s3 + $0x78] sm:$0xff] }
   0x7   :  { %v30_v16 = vld [vmem:[%s435_s0] sm:$0xff]  ;;  %181 = vmatpush.msra.mxu1 %v180_v18  ;;  %237 = vmatpush.msra.mxu3 %v180_v18  ;;  %v179_v19 = vld [vmem:[%s437_s3 + $0x70] sm:$0xff]  ;;  %v178_v20 = vld [vmem:[%s437_s3 + $0x68] sm:$0xff] }
   0x8   :  { %55 = vmatpush.msra.mxu0 %v44_v3  ;;  %224 = vmatpush.msra.mxu2 %v44_v3  ;;  %v177_v21 = vld [vmem:[%s437_s3 + $0x60] sm:$0xff]  ;;  %v176_v23 = vld [vmem:[%s437_s3 + $0x58] sm:$0xff]  ;;  %v175_v25 = vld [vmem:[%s437_s3 + $0x50] sm:$0xff] }
   0x9   :  { %182 = vmatpush.msra.mxu1 %v179_v19  ;;  %238 = vmatpush.msra.mxu3 %v179_v19  ;;  %v253_v22 = vld [vmem:[%s434_s2] ss:$0 sm:$0xff]  ;;  %v174_v27 = vld [vmem:[%s437_s3 + $0x48] sm:$0xff]  ;;  %v172_v30 = vld [vmem:[%s437_s3 + $0x38] sm:$0xff] }
   0xa   :  { %56 = vmatpush.msra.mxu0 %v43_v4  ;;  %225 = vmatpush.msra.mxu2 %v43_v4  ;;  %v173_v29 = vld [vmem:[%s437_s3 + $0x40] sm:$0xff]  ;;  %v171_v33 = vld [vmem:[%s437_s3 + $0x30] sm:$0xff]  ;;  %v170_v36 = vld [vmem:[%s437_s3 + $0x28] sm:$0xff] }
   0xb   :  { %183 = vmatpush.msra.mxu1 %v178_v20  ;;  %239 = vmatpush.msra.mxu3 %v178_v20  ;;  %v169_v39 = vld [vmem:[%s437_s3 + $0x20] sm:$0xff]  ;;  %v168_v43 = vld [vmem:[%s437_s3 + $0x18] sm:$0xff]  ;;  %v167_v47 = vld [vmem:[%s437_s3 + $0x10] sm:$0xff] }
   0xc   :  { %57 = vmatpush.msra.mxu0 %v42_v5  ;;  %226 = vmatpush.msra.mxu2 %v42_v5  ;;  %v166_v52 = vld [vmem:[%s437_s3 + $0x8] sm:$0xff]  ;;  %v165_v56 = vld [vmem:[%s437_s3] sm:$0xff] }
   0xd   :  { %184 = vmatpush.msra.mxu1 %v177_v21  ;;  %240 = vmatpush.msra.mxu3 %v177_v21 }
   0xe   :  { %58 = vmatpush.msra.mxu0 %v41_v6  ;;  %227 = vmatpush.msra.mxu2 %v41_v6 }
   0xf   :  { %185 = vmatpush.msra.mxu1 %v176_v23  ;;  %241 = vmatpush.msra.mxu3 %v176_v23 }
  0x10   :  { %59 = vmatpush.msra.mxu0 %v40_v7  ;;  %228 = vmatpush.msra.mxu2 %v40_v7 }
  0x11   :  { %186 = vmatpush.msra.mxu1 %v175_v25  ;;  %242 = vmatpush.msra.mxu3 %v175_v25 }
  0x12   :  { %60 = vmatpush.msra.mxu0 %v39_v8  ;;  %229 = vmatpush.msra.mxu2 %v39_v8 }
  0x13   :  { %187 = vmatpush.msra.mxu1 %v174_v27  ;;  %243 = vmatpush.msra.mxu3 %v174_v27 }
  0x14   :  { %61 = vmatpush.msra.mxu0 %v38_v9  ;;  %230 = vmatpush.msra.mxu2 %v38_v9 }
  0x15   :  { %188 = vmatpush.msra.mxu1 %v173_v29  ;;  %244 = vmatpush.msra.mxu3 %v173_v29 }
  0x16   :  { %62 = vmatpush.msra.mxu0 %v37_v10  ;;  %231 = vmatpush.msra.mxu2 %v37_v10 }
  0x17   :  { %189 = vmatpush.msra.mxu1 %v172_v30  ;;  %245 = vmatpush.msra.mxu3 %v172_v30 }
  0x18   :  { %63 = vmatpush.msra.mxu0 %v36_v11  ;;  %232 = vmatpush.msra.mxu2 %v36_v11 }
  0x19   :  { %190 = vmatpush.msra.mxu1 %v171_v33  ;;  %246 = vmatpush.msra.mxu3 %v171_v33 }
  0x1a   :  { %64 = vmatpush.msra.mxu0 %v35_v12  ;;  %233 = vmatpush.msra.mxu2 %v35_v12 }
  0x1b   :  { %191 = vmatpush.msra.mxu1 %v170_v36  ;;  %247 = vmatpush.msra.mxu3 %v170_v36 }
  0x1c   :  { %65 = vmatpush.msra.mxu0 %v34_v13  ;;  %234 = vmatpush.msra.mxu2 %v34_v13 }
  0x1d   :  { %192 = vmatpush.msra.mxu1 %v169_v39  ;;  %248 = vmatpush.msra.mxu3 %v169_v39 }
  0x1e   :  { %66 = vmatpush.msra.mxu0 %v33_v14  ;;  %235 = vmatpush.msra.mxu2 %v33_v14 }
  0x1f   :  { %193 = vmatpush.msra.mxu1 %v168_v43  ;;  %249 = vmatpush.msra.mxu3 %v168_v43 }
  0x20   :  { %67 = vmatpush.msra.mxu0 %v32_v15  ;;  %236 = vmatpush.msra.mxu2 %v32_v15 }
  0x21   :  { %68 = vmatmul.f32.vlgmr.msra.gmra.mxu0 %v30_v16  ;;  %71 = vmatmul.f32.vlgmr.msra.gmra.mxu2 %v31_v17 }
  0x22   :  { %194 = vmatpush.msra.mxu1 %v167_v47  ;;  %250 = vmatpush.msra.mxu3 %v167_v47 }
  0x24   :  { %195 = vmatpush.msra.mxu1 %v166_v52  ;;  %251 = vmatpush.msra.mxu3 %v166_v52 }
  0x26   :  { %196 = vmatpush.msra.mxu1 %v165_v56  ;;  %252 = vmatpush.msra.mxu3 %v165_v56  ;;  %v254_v56 = vld [vmem:[%s436_s4] ss:$0 sm:$0xff] }
  0x9e   :  { %v69_v24 = vpop.f32.mrf.mxu0 }
  0x9f   :  { %v364_v26 = vadd.f32 %v253_v22, %v69_v24 }
  0xa1   :  { %v370_v28 = vmul.f32 0.70710677, %v364_v26  ;;  %v75_v47 = vmul.f32 0.5, %v364_v26 }
  0xa3   :  { %v79_v31 = vmul.f32 %v370_v28, %v370_v28 }
  0xa4   :  { %v72_v32 = vpop.f32.mrf.mxu2 }
  0xa5   :  { %v383_v34 = vmin.f32 %v79_v31, 16.0  ;;  %v385_v35 = vadd.f32 %v253_v22, %v72_v32 }
  0xa7   :  { %v81_v37 = vmul.f32 2.1237322e-06, %v383_v34  ;;  %v392_v38 = vmul.f32 0.70710677, %v385_v35  ;;  %v92_v40 = vmul.f32 3.8918573e-05, %v383_v34 }
  0xa9   :  { %v82_v41 = vadd.f32 0.00028619796, %v81_v37  ;;  %v119_v42 = vmul.f32 %v392_v38, %v392_v38  ;;  %v93_v44 = vadd.f32 0.001143296, %v92_v40 }
  0xab   :  { %v83_v45 = vmul.f32 %v82_v41, %v383_v34  ;;  %v120_v46 = vmin.f32 %v119_v42, 16.0  ;;  %v94_v48 = vmul.f32 %v93_v44, %v383_v34 }
  0xad   :  { %v121_v49 = vmul.f32 2.1237322e-06, %v120_v46  ;;  %v132_v50 = vmul.f32 3.8918573e-05, %v120_v46  ;;  %v84_v51 = vadd.f32 0.0036580483, %v83_v45 }
  0xae   :  { %v95_v53 = vadd.f32 0.014752088, %v94_v48 }
  0xaf   :  { %v122_v54 = vadd.f32 0.00028619796, %v121_v49  ;;  %v133_v55 = vadd.f32 0.001143296, %v132_v50  ;;  %v85_v60 = vmul.f32 %v84_v51, %v383_v34 }
  0xb0   :  { %v96_v57 = vmul.f32 %v95_v53, %v383_v34  ;;  %v76_v53 = vmul.f32 0.5, %v385_v35 }
  0xb1   :  { %v123_v58 = vmul.f32 %v122_v54, %v120_v46  ;;  %v134_v59 = vmul.f32 %v133_v55, %v120_v46  ;;  %v86_v2 = vadd.f32 0.05243302, %v85_v60 }
  0xb2   :  { %v97_v61 = vadd.f32 0.112945676, %v96_v57 }
  0xb3   :  { %v124_v62 = vadd.f32 0.0036580483, %v123_v58  ;;  %v135_v63 = vadd.f32 0.014752088, %v134_v59  ;;  %v87_v8 = vmul.f32 %v86_v2, %v383_v34 }
  0xb4   :  { %v98_v0 = vmul.f32 %v97_v61, %v383_v34 }
  0xb5   :  { %v136_v1 = vmul.f32 %v135_v63, %v120_v46  ;;  %v125_v4 = vmul.f32 %v124_v62, %v120_v46  ;;  %v88_v13 = vadd.f32 0.18741608, %v87_v8 }
  0xb6   :  { %v99_v3 = vadd.f32 0.4994258, %v98_v0 }
  0xb7   :  { %v137_v5 = vadd.f32 0.112945676, %v136_v1  ;;  %v126_v10 = vadd.f32 0.05243302, %v125_v4  ;;  %v89_v17 = vmul.f32 %v88_v13, %v383_v34 }
  0xb8   :  { %v100_v6 = vmul.f32 %v99_v3, %v383_v34 }
  0xb9   :  { %v138_v7 = vmul.f32 %v137_v5, %v120_v46  ;;  %v127_v14 = vmul.f32 %v126_v10, %v120_v46  ;;  %v90_v21 = vadd.f32 1.1283791, %v89_v17 }
  0xba   :  { %v101_v9 = vadd.f32 1.0, %v100_v6 }
  0xbb   :  { %v139_v11 = vadd.f32 0.4994258, %v138_v7  ;;  %v128_v18 = vadd.f32 0.18741608, %v127_v14  ;;  %v91_v31 = vmul.f32 %v90_v21, %v370_v28 }
  0xbc   :  { %255 = vrcp.f32 %v101_v9  ;;  %v113_v22 = vand.u32 2147483648, %v101_v9  ;;  %v111_v27 = vand.u32 2147483647, %v101_v9  ;;  %vm107_vm1 = vweird.f32 %v101_v9 }
  0xbd   :  { %v140_v12 = vmul.f32 %v139_v11, %v120_v46  ;;  %v129_v24 = vmul.f32 %v128_v18, %v120_v46 }
  0xbe   :  { %v114_v32 = vor.u32 1.1754944e-38, %v113_v22  ;;  %vm112_vm3 = vcmp.eq.f32.partialorder %v111_v27, 8.507059e+37 }
  0xbf   :  { %v141_v15 = vadd.f32 1.0, %v140_v12  ;;  %v130_v36 = vadd.f32 1.1283791, %v129_v24 }
  0xc1   :  { %257 = vrcp.f32 %v141_v15  ;;  %v153_v37 = vand.u32 2147483648, %v141_v15  ;;  %v151_v41 = vand.u32 2147483647, %v141_v15  ;;  %vm147_vm5 = vweird.f32 %v141_v15 }
  0xc2   :  { %v256_v16 = vpop.eup %255  ;;  %v131_v46 = vmul.f32 %v130_v36, %v392_v38 }
  0xc3   :  { %v103_v19 = vmul.f32 %v256_v16, %v101_v9  ;;  %vm108_vm0 = vweird.f32 %v256_v16  ;;  %v154_v45 = vor.u32 1.1754944e-38, %v153_v37  ;;  %vm152_vm7 = vcmp.eq.f32.partialorder %v151_v41, 8.507059e+37 }
  0xc4   :  { %vm109_vm2 = vmor %vm107_vm1, %vm108_vm0 }
  0xc5   :  { %v104_v20 = vsub.f32 1.0, %v103_v19 }
  0xc7   :  { %v258_v23 = vpop.eup %257  ;;  %v105_v25 = vmul.f32 %v256_v16, %v104_v20 }
  0xc8   :  { %v143_v29 = vmul.f32 %v258_v23, %v141_v15  ;;  %vm148_vm4 = vweird.f32 %v258_v23 }
  0xc9   :  { %v106_v30 = vadd.f32 %v256_v16, %v105_v25  ;;  %vm149_vm6 = vmor %vm147_vm5, %vm148_vm4 }
  0xca   :  { %v144_v33 = vsub.f32 1.0, %v143_v29 }
  0xcb   :  { %v110_v34 = vsel %vm109_vm2, %v256_v16, %v106_v30 }
  0xcc   :  { %v115_v39 = vsel %vm112_vm3, %v114_v32, %v110_v34  ;;  %v145_v40 = vmul.f32 %v258_v23, %v144_v33 }
  0xcd   :  { %v116_v42 = vmul.f32 %v115_v39, %v91_v31 }
  0xce   :  { %v146_v43 = vadd.f32 %v258_v23, %v145_v40 }
  0xcf   :  { %v219_v44 = vclamps-f32 %v116_v42, 1.0 }
  0xd0   :  { %v150_v28 = vsel %vm149_vm6, %v258_v23, %v146_v43 }
  0xd1   :  { %v159_v48 = vadd.f32 1.0, %v219_v44  ;;  %v155_v49 = vsel %vm152_vm7, %v154_v45, %v150_v28 }
  0xd2   :  { %v156_v50 = vmul.f32 %v155_v49, %v131_v46 }
  0xd3   :  { %v161_v51 = vmul.f32 %v159_v48, %v75_v47 }
  0xd4   :  { %v220_v52 = vclamps-f32 %v156_v50, 1.0 }
  0xd5   :  { %197 = vmatmul.f32.vlgmr.msra.gmra.mxu1 %v161_v51 }
  0xd6   :  { %v160_v54 = vadd.f32 1.0, %v220_v52 }
  0xd8   :  { %v162_v55 = vmul.f32 %v160_v54, %v76_v53 }
  0xda   :  { %200 = vmatmul.f32.vlgmr.msra.gmra.mxu3 %v162_v55 }
 0x152   :  { %v198_v38 = vpop.f32.mrf.mxu1 }
 0x153   :  { %v204_v57 = vadd.f32 %v254_v56, %v198_v38 }
 0x155   :  { %213 = vst [vmem:[%s438_s5] sm:$0xff] %v204_v57 }
 0x15d   :  { %v201_v26 = vpop.f32.mrf.mxu3 }
 0x15e   :  { %v205_v58 = vadd.f32 %v254_v56, %v201_v26 }
 0x160   :  { %214 = vst [vmem:[%s438_s5 + $0x8] sm:$0xff] %v205_v58 }

</bundles_post_ra>
